<compile_context>
chip_gen: v5e
topology: v5e:2x2
jax: 0.10.0
libtpu: 0.0.40
codegen_flags: <defaults>
</compile_context>

<pallas_src>
import functools

import jax
import jax.numpy as jnp
from jax.experimental import pallas as pl
from jax.experimental.pallas import tpu as pltpu


def _cdiv(a, b):
    return (a + b - 1) // b


def _round_up(x, m):
    return _cdiv(x, m) * m


def _choose_block(total, align, cap):
    """Pick a block size (multiple of `align`, <= cap) minimising round-up waste."""
    cap = min(max(align, cap // align * align), _round_up(total, align))
    best, best_cost = align, None
    c = align
    while c <= cap:
        cost = _cdiv(total, c) * c
        if best_cost is None or cost < best_cost or (cost == best_cost and c > best):
            best, best_cost = c, cost
        c += align
    return best


# ----------------------------------------------------------------------------
# Fused single-pass kernel (slab resident in VMEM).
#
# MLP bookkeeping is expressed with only 2-D dots and (rows, 1) broadcasts via
# precomputed matrices (built once in XLA from the weights, negligible cost):
#   P   (R, B):  P[r, b]  = 1 if r // C == b
#   A1  (R, nb): A1[r, j] = w1[r % C, j]                (pooled-channel rows of w1)
#   A2s (R, nb): A2s[r, j] = w2[j, r % C]               (scale half of w2)
#   A2h (R, nb): A2h[r, j] = w2[j, C + r % C]           (shift half of w2)
#   aux (B, nb): x_aux @ w1[C:]                          (input-independent of fm)
# ----------------------------------------------------------------------------
def _fused_kernel(fm_ref, aux_ref, p_ref, pt_ref, a1_ref, a2s_ref, a2h_ref,
                  out_ref, *, inv_s):
    fm = fm_ref[...].astype(jnp.float32)                          # (R, S)
    pool = jnp.sum(fm, axis=-1, keepdims=True) * inv_s            # (R, 1)

    y = pool * a1_ref[...]                                        # (R, nb)
    h = jnp.dot(pt_ref[...], y,
                preferred_element_type=jnp.float32) + aux_ref[...]  # (B, nb)
    h = jnp.maximum(h, 0.0)
    h_rows = jnp.dot(p_ref[...], h,
                     preferred_element_type=jnp.float32)          # (R, nb)
    scale = jnp.sum(h_rows * a2s_ref[...], axis=-1, keepdims=True)  # (R, 1)
    shift = jnp.sum(h_rows * a2h_ref[...], axis=-1, keepdims=True)  # (R, 1)

    # FiLM from the VMEM-resident copy, f32 math, cast only at the store.
    out_ref[...] = (scale * fm_ref[...].astype(jnp.float32)
                    + shift).astype(out_ref.dtype)


def _daft_fused(feature_map, x_aux, w1, w2, vmem_limit_bytes):
    B, C, D, H, W = feature_map.shape
    S = D * H * W
    R = B * C
    f32 = jnp.float32

    fm2 = feature_map.reshape(R, S)                               # free reshape
    w1f = w1.astype(f32)
    w2f = w2.astype(f32)
    w1a, w1b = w1f[:C], w1f[C:]

    aux_term = jnp.dot(x_aux.astype(f32), w1b,
                       precision=jax.lax.Precision.HIGHEST)        # (B, nb)
    P = (jnp.arange(R)[:, None] // C == jnp.arange(B)[None, :]).astype(f32)
    PT = P.T                                                      # (B, R)
    A1 = jnp.tile(w1a, (B, 1))                                    # (R, nb)
    A2s = jnp.tile(w2f[:, :C].T, (B, 1))                          # (R, nb)
    A2h = jnp.tile(w2f[:, C:].T, (B, 1))                          # (R, nb)

    out = pl.pallas_call(
        functools.partial(_fused_kernel, inv_s=1.0 / float(S)),
        out_shape=jax.ShapeDtypeStruct((R, S), feature_map.dtype),
        compiler_params=pltpu.CompilerParams(
            vmem_limit_bytes=vmem_limit_bytes),
    )(fm2, aux_term, P, PT, A1, A2s, A2h)
    return out.reshape(B, C, D, H, W)


# ----------------------------------------------------------------------------
# Streaming two-kernel path (slab too large for VMEM).
# ----------------------------------------------------------------------------
def _pool_kernel(fm_ref, psum_ref, acc_ref, *, s_total, sb, n_groups):
    """Per-row partial sums.  acc (Rb, 128) is VPU-only; one XLU reduce at finalize."""
    p = pl.program_id(1)
    s = pl.program_id(2)
    ns = pl.num_programs(2)

    @pl.when(s == 0)
    def _init():
        acc_ref[...] = jnp.zeros_like(acc_ref)

    col0 = (p * ns + s) * sb                                      # logical chunk start

    def body(g, acc):
        off = pl.multiple_of(g * 128, 128)
        xg = fm_ref[:, pl.ds(off, 128)].astype(jnp.float32)       # (Rb, 128)
        col = col0 + off + jax.lax.broadcasted_iota(jnp.int32, xg.shape, 1)
        return acc + jnp.where(col < s_total, xg, 0.0)            # mask ragged tail

    acc_ref[...] = jax.lax.fori_loop(0, n_groups, body, acc_ref[...])

    @pl.when(s == ns - 1)
    def _finalize():
        psum_ref[0] = jnp.sum(acc_ref[...], axis=-1, keepdims=True)


def _film_kernel(fm_ref, ss_ref, out_ref):
    """out = scale * fm + shift; (Rb, 1) params broadcast over lanes, f32 math."""
    fm = fm_ref[...].astype(jnp.float32)
    scale = ss_ref[:, 0:1]
    shift = ss_ref[:, 1:2]
    out_ref[...] = (scale * fm + shift).astype(out_ref.dtype)


def _daft_streamed(feature_map, x_aux, w1, w2, target_block_bytes,
                   vmem_limit_bytes):
    B, C, D, H, W = feature_map.shape
    S = D * H * W
    R = B * C
    dtype = feature_map.dtype
    ebytes = jnp.dtype(dtype).itemsize
    f32 = jnp.float32

    fm2 = feature_map.reshape(R, S)                               # free reshape, no pad

    # --- tile selection: minimise round-up waste (review item 2) ------------
    row_align = max(8, 32 // ebytes)                              # 8 f32 / 16 bf16
    Rb = _choose_block(R, row_align, 128)
    n_r = _cdiv(R, Rb)
    lane_cap = max(128, target_block_bytes // (Rb * ebytes))
    Sb = _choose_block(S, 128, lane_cap)
    n_s = _cdiv(S, Sb)

    # Extra parallel split of the reduction so both v7x TensorCores get work
    # even when the row axis has a single block.
    n_split = 2 if (n_r == 1 and n_s >= 2) else 1
    n_s_inner = _cdiv(n_s, n_split)

    # --- kernel 1: global average pool (partial sums per split) -------------
    def pool_fm_idx(r, p, s):
        return (r, jnp.minimum(p * n_s_inner + s, n_s - 1))       # clamp fully-OOB chunks

    psums = pl.pallas_call(
        functools.partial(_pool_kernel, s_total=S, sb=Sb, n_groups=Sb // 128),
        out_shape=jax.ShapeDtypeStruct((n_split, R, 1), f32),
        grid_spec=pltpu.PrefetchScalarGridSpec(
            num_scalar_prefetch=0,
            grid=(n_r, n_split, n_s_inner),
            in_specs=[pl.BlockSpec((Rb, Sb), pool_fm_idx)],
            out_specs=pl.BlockSpec((1, Rb, 1), lambda r, p, s: (p, r, 0)),
            scratch_shapes=[pltpu.VMEM((Rb, 128), f32)]),
        compiler_params=pltpu.CompilerParams(
            dimension_semantics=("parallel", "parallel", "arbitrary"),
            vmem_limit_bytes=vmem_limit_bytes),
    )(fm2)

    # --- prologue: tiny batched MLP in plain XLA -----------------------------
    prec = jax.lax.Precision.HIGHEST
    pool = jnp.sum(psums, axis=0) * (1.0 / float(S))              # (R, 1) f32 means
    squeeze = pool.reshape(B, C)
    cat = jnp.concatenate([squeeze, x_aux.astype(f32)], axis=1)
    h = jnp.maximum(jnp.dot(cat, w1.astype(f32), precision=prec), 0.0)
    attn = jnp.dot(h, w2.astype(f32), precision=prec)             # (B, 2C)
    ss = jnp.concatenate([attn[:, :C].reshape(R, 1),
                          attn[:, C:].reshape(R, 1)], axis=1)     # (R, 2) packed

    # --- kernel 2: FiLM apply (streaming, bandwidth-bound) -------------------
    out = pl.pallas_call(
        _film_kernel,
        out_shape=jax.ShapeDtypeStruct((R, S), dtype),
        grid_spec=pltpu.PrefetchScalarGridSpec(
            num_scalar_prefetch=0,
            grid=(n_r, n_s),
            in_specs=[pl.BlockSpec((Rb, Sb), lambda r, s: (r, s)),
                      pl.BlockSpec((Rb, 2), lambda r, s: (r, 0))],
            out_specs=pl.BlockSpec((Rb, Sb), lambda r, s: (r, s)),
        ),
        compiler_params=pltpu.CompilerParams(
            dimension_semantics=("parallel", "parallel"),
            vmem_limit_bytes=vmem_limit_bytes),
    )(fm2, ss)
    return out.reshape(B, C, D, H, W)


# ----------------------------------------------------------------------------
# Public entry point.
# ----------------------------------------------------------------------------
def daft_block(feature_map, x_aux, w1, w2, *, fuse=None,
               target_block_bytes=6 * 1024 * 1024,
               fused_vmem_budget=24 * 1024 * 1024,
               vmem_limit_bytes=48 * 1024 * 1024):
    """feature_map: (B, C, D, H, W); x_aux: (B, ndim_non_img).
    w1: (C + ndim_non_img, bottleneck)  == PyTorch aux_base.weight.T
    w2: (bottleneck, 2*C)               == PyTorch aux_out.weight.T
    """
    B, C, D, H, W = feature_map.shape
    S = D * H * W
    R = B * C
    ebytes = jnp.dtype(feature_map.dtype).itemsize
    sub = max(8, 32 // ebytes)

    s128 = _round_up(S, 128)
    in_out_bytes = 2 * _round_up(R, sub) * s128 * ebytes          # in + out buffers
    f32_tmp_bytes = 2 * _round_up(R, 8) * s128 * 4                # f32 working slabs
    fused_need = in_out_bytes + f32_tmp_bytes + (2 << 20)
    if fuse is None:
        fuse = fused_need <= fused_vmem_budget

    if fuse:
        return _daft_fused(feature_map, x_aux, w1, w2, vmem_limit_bytes)
    return _daft_streamed(feature_map, x_aux, w1, w2, target_block_bytes,
                          vmem_limit_bytes)


def daft_ref(feature_map, x_aux, w1, w2):
    """Pure-JAX reference matching the PyTorch forward (f32, HIGHEST precision)."""
    C = feature_map.shape[1]
    prec = jax.lax.Precision.HIGHEST
    fm = feature_map.astype(jnp.float32)
    squeeze = jnp.mean(fm, axis=(2, 3, 4))
    cat = jnp.concatenate([squeeze, x_aux.astype(jnp.float32)], axis=1)
    h = jnp.maximum(jnp.dot(cat, w1.astype(jnp.float32), precision=prec), 0.0)
    attn = jnp.dot(h, w2.astype(jnp.float32), precision=prec)
    v_scale = attn[:, :C][:, :, None, None, None]
    v_shift = attn[:, C:][:, :, None, None, None]
    return v_scale * fm + v_shift


if __name__ == "__main__":
    # Shapes consistent with the module: in_channels=4, bottleneck=32,
    # ndim_non_img=3, batch=2, spatial 8x8x8 (S = 512).
    B, C, D, H, W = 2, 4, 8, 8, 8
    ndim_non_img, bottleneck = 3, 32

    key = jax.random.PRNGKey(0)
    k1, k2, k3, k4, k5, k6 = jax.random.split(key, 6)

    feature_map = jax.random.normal(k1, (B, C, D, H, W), dtype=jnp.float32)
    x_aux = jax.random.normal(k2, (B, ndim_non_img), dtype=jnp.float32)
    w1 = 0.1 * jax.random.normal(k3, (C + ndim_non_img, bottleneck), jnp.float32)
    w2 = 0.1 * jax.random.normal(k4, (bottleneck, 2 * C), jnp.float32)

    ref = daft_ref(feature_map, x_aux, w1, w2)

    # 1) Fused single-pass path (slab fits VMEM); in-kernel MXU dots may run at
    #    default (bf16-ish) precision, so compare with a modest tolerance.
    out_fused = jax.block_until_ready(jax.jit(daft_block)(feature_map, x_aux, w1, w2))
    assert out_fused.shape == ref.shape == (B, C, D, H, W)
    assert jnp.allclose(out_fused, ref, atol=1e-2, rtol=1e-2), "fused mismatch"

    # 2) Streaming two-kernel path on the same inputs.
    run_stream = jax.jit(functools.partial(daft_block, fuse=False))
    out_stream = jax.block_until_ready(run_stream(feature_map, x_aux, w1, w2))
    assert jnp.allclose(out_stream, ref, atol=1e-4, rtol=1e-4), "streamed mismatch"

    # 3) Awkward non-aligned shape exercising ragged row/lane tails, the masked
    #    pool tail, and the parallel S-split of the pool reduction.
    B2, C2, D2, H2, W2 = 1, 3, 5, 7, 9
    fm_b = jax.random.normal(k5, (B2, C2, D2, H2, W2), dtype=jnp.float32)
    aux_b = jax.random.normal(k6, (B2, ndim_non_img), dtype=jnp.float32)
    w1_b = 0.1 * jax.random.normal(k3, (C2 + ndim_non_img, bottleneck), jnp.float32)
    w2_b = 0.1 * jax.random.normal(k4, (bottleneck, 2 * C2), jnp.float32)
    ref_b = daft_ref(fm_b, aux_b, w1_b, w2_b)
    run_b = jax.jit(functools.partial(daft_block, fuse=False,
                                      target_block_bytes=4096))
    out_b = jax.block_until_ready(run_b(fm_b, aux_b, w1_b, w2_b))
    assert jnp.allclose(out_b, ref_b, atol=1e-4, rtol=1e-4), "ragged mismatch"

    # 4) bf16 feature map through the fused path (f32 math, cast at store).
    fm16 = feature_map.astype(jnp.bfloat16)
    out16 = jax.block_until_ready(jax.jit(daft_block)(fm16, x_aux, w1, w2))
    ref16 = daft_ref(fm16, x_aux, w1, w2)
    assert jnp.allclose(out16.astype(jnp.float32), ref16, atol=5e-2, rtol=5e-2), \
        "bf16 mismatch"

    print("KERNEL_OK")
</pallas_src>

<mosaic_0001>
module attributes {stable_mosaic.version = 11 : i64} {
  func.func @_fused_kernel(%arg0: memref<8x512xf32, #tpu.memory_space<vmem>>, %arg1: memref<2x32xf32, #tpu.memory_space<vmem>>, %arg2: memref<8x2xf32, #tpu.memory_space<vmem>>, %arg3: memref<2x8xf32, #tpu.memory_space<vmem>>, %arg4: memref<8x32xf32, #tpu.memory_space<vmem>>, %arg5: memref<8x32xf32, #tpu.memory_space<vmem>>, %arg6: memref<8x32xf32, #tpu.memory_space<vmem>>, %arg7: memref<8x512xf32, #tpu.memory_space<vmem>>) attributes {dimension_semantics = [], scalar_prefetch = 0 : i64, scratch_operands = 0 : i64, tpu.core_type = #tpu.core_type<tc>} {
    %c0 = arith.constant 0 : index
    %c0_0 = arith.constant 0 : index
    %0 = vector.load %arg0[%c0, %c0_0] : memref<8x512xf32, #tpu.memory_space<vmem>>, vector<8x512xf32>
    %cst = arith.constant dense<0.000000e+00> : vector<8xf32>
    %1 = vector.multi_reduction <add>, %0, %cst [1] : vector<8x512xf32> to vector<8xf32>
    %2 = vector.shape_cast %1 : vector<8xf32> to vector<8x1xf32>
    %cst_1 = arith.constant 0.001953125 : f32
    %3 = vector.broadcast %cst_1 : f32 to vector<8x1xf32>
    %4 = arith.mulf %2, %3 : vector<8x1xf32>
    %c0_2 = arith.constant 0 : index
    %c0_3 = arith.constant 0 : index
    %5 = vector.load %arg4[%c0_2, %c0_3] : memref<8x32xf32, #tpu.memory_space<vmem>>, vector<8x32xf32>
    %6 = vector.broadcast %4 : vector<8x1xf32> to vector<8x32xf32>
    %7 = arith.mulf %6, %5 : vector<8x32xf32>
    %c0_4 = arith.constant 0 : index
    %c0_5 = arith.constant 0 : index
    %8 = vector.load %arg3[%c0_4, %c0_5] : memref<2x8xf32, #tpu.memory_space<vmem>>, vector<2x8xf32>
    %cst_6 = arith.constant dense<0.000000e+00> : vector<2x32xf32>
    %9 = tpu.matmul %8, %7, %cst_6 {dimension_numbers = #tpu.dot_dimension_numbers<[1], [0], [0], [1], [0, 0, 1, 1], [], []>} : vector<2x8xf32>, vector<8x32xf32>, vector<2x32xf32> -> vector<2x32xf32>
    %c0_7 = arith.constant 0 : index
    %c0_8 = arith.constant 0 : index
    %10 = vector.load %arg1[%c0_7, %c0_8] : memref<2x32xf32, #tpu.memory_space<vmem>>, vector<2x32xf32>
    %11 = arith.addf %9, %10 : vector<2x32xf32>
    %cst_9 = arith.constant 0.000000e+00 : f32
    %12 = vector.broadcast %cst_9 : f32 to vector<2x32xf32>
    %13 = arith.maximumf %11, %12 : vector<2x32xf32>
    %c0_10 = arith.constant 0 : index
    %c0_11 = arith.constant 0 : index
    %14 = vector.load %arg2[%c0_10, %c0_11] : memref<8x2xf32, #tpu.memory_space<vmem>>, vector<8x2xf32>
    %cst_12 = arith.constant dense<0.000000e+00> : vector<8x32xf32>
    %15 = tpu.matmul %14, %13, %cst_12 {dimension_numbers = #tpu.dot_dimension_numbers<[1], [0], [0], [1], [0, 0, 1, 1], [], []>} : vector<8x2xf32>, vector<2x32xf32>, vector<8x32xf32> -> vector<8x32xf32>
    %c0_13 = arith.constant 0 : index
    %c0_14 = arith.constant 0 : index
    %16 = vector.load %arg5[%c0_13, %c0_14] : memref<8x32xf32, #tpu.memory_space<vmem>>, vector<8x32xf32>
    %17 = arith.mulf %15, %16 : vector<8x32xf32>
    %cst_15 = arith.constant dense<0.000000e+00> : vector<8xf32>
    %18 = vector.multi_reduction <add>, %17, %cst_15 [1] : vector<8x32xf32> to vector<8xf32>
    %19 = vector.shape_cast %18 : vector<8xf32> to vector<8x1xf32>
    %c0_16 = arith.constant 0 : index
    %c0_17 = arith.constant 0 : index
    %20 = vector.load %arg6[%c0_16, %c0_17] : memref<8x32xf32, #tpu.memory_space<vmem>>, vector<8x32xf32>
    %21 = arith.mulf %15, %20 : vector<8x32xf32>
    %cst_18 = arith.constant dense<0.000000e+00> : vector<8xf32>
    %22 = vector.multi_reduction <add>, %21, %cst_18 [1] : vector<8x32xf32> to vector<8xf32>
    %23 = vector.shape_cast %22 : vector<8xf32> to vector<8x1xf32>
    %c0_19 = arith.constant 0 : index
    %c0_20 = arith.constant 0 : index
    %24 = vector.load %arg0[%c0_19, %c0_20] : memref<8x512xf32, #tpu.memory_space<vmem>>, vector<8x512xf32>
    %25 = vector.broadcast %19 : vector<8x1xf32> to vector<8x512xf32>
    %26 = arith.mulf %25, %24 : vector<8x512xf32>
    %27 = vector.broadcast %23 : vector<8x1xf32> to vector<8x512xf32>
    %28 = arith.addf %26, %27 : vector<8x512xf32>
    %c0_21 = arith.constant 0 : index
    %c0_22 = arith.constant 0 : index
    %29 = vector.load %arg7[%c0_21, %c0_22] : memref<8x512xf32, #tpu.memory_space<vmem>>, vector<8x512xf32>
    tpu.vector_store %arg7[%c0_21, %c0_22], %28 {strides = array<i32>} : memref<8x512xf32, #tpu.memory_space<vmem>>, vector<8x512xf32>,
    return
  }
}

</mosaic_0001>

<bundles_post_ra>
// kernel: daft_block.1
= control target key start
LH: loop header
LB: loop body
LE: loop exit
PB: predicated region body
PF: predicated region fallthrough
CT: control target
= control target key end

     0   :  { %vm40_vm0 = vcmask 64512   ;;  %vm70_vm1 = vcmask 1041408   ;;  %vm66_vm2 = vcmask 15360   ;;  %vm96_vm3 = vcmask 261120   ;;  %s206_s0 = inlined_call_operand.vmem [shape: f32[8,512], index: 0, kind: input, shape index: {}]   ;;  %s207_s4 = inlined_call_operand.vmem [shape: f32[8,32], index: 4, kind: input, shape index: {}]   ;;  %s208_s3 = inlined_call_operand.vmem [shape: f32[2,8], index: 3, kind: input, shape index: {}]   ;;  %s209_s1 = inlined_call_operand.vmem [shape: f32[2,32], index: 1, kind: input, shape index: {}]   ;;  %s210_s2 = inlined_call_operand.vmem [shape: f32[8,2], index: 2, kind: input, shape index: {}]   ;;  %s211_s5 = inlined_call_operand.vmem [shape: f32[8,32], index: 5, kind: input, shape index: {}]   ;;  %s212_s6 = inlined_call_operand.vmem [shape: f32[8,32], index: 6, kind: input, shape index: {}]   ;;  %s213_s7 = inlined_call_operand.vmem [shape: f32[8,512], index: 7, kind: output, shape index: {}]  }
   0x1   :  { %v26_v0 = vld [vmem:[%s206_s0] sm:$0xff]  ;;  %v27_v1 = vld [vmem:[%s206_s0 + $0x8] sm:$0xff]  ;;  %v28_v2 = vld [vmem:[%s206_s0 + $0x10] sm:$0xff] }
   0x2   :  { %v30_v3 = vadd.f32 %v27_v1, %v26_v0  ;;  %v29_v4 = vld [vmem:[%s206_s0 + $0x18] sm:$0xff]  ;;  %v36_v8 = vld [vmem:[%s207_s4] sm:$0xff] }
   0x3   :  { %v38_v11 = vld [vmem:[%s208_s3] sm:$0x3] }
   0x4   :  { %v31_v5 = vadd.f32 %v30_v3, %v28_v2  ;;  %v39_v12 = vld [vmem:[%s209_s1] sm:$0x3] }
   0x5   :  { %v65_v16 = vld [vmem:[%s210_s2] sm:$0xff] }
   0x6   :  { %v32_v6 = vadd.f32 %v31_v5, %v29_v4  ;;  %v94_v17 = vld [vmem:[%s211_s5] sm:$0xff] }
   0x7   :  { %v100_v18 = vld [vmem:[%s212_s6] sm:$0xff] }
   0x8   :  { %33 = vadd.xlane.f32.xlu0 %v32_v6 }
  0x7b   :  { %v34_v7 = vpop.xlane.xlu0 %33 }
  0x7c   :  { %v35_v9 = vmul.f32 0.001953125, %v34_v7 }
  0x7e   :  { %v37_v10 = vmul.f32 %v36_v8, %v35_v9 }
  0x80   :  { %59 = vmatpush.msra.mxu0 %v37_v10 }
  0x81   :  { %121 = vmatmul.msk.f32.vlgmr.msra.gmra.mxu0 %vm40_vm0, %v38_v11 }
  0xfe   :  { %v61_v13 = vpop.f32.mrf.mxu0 }
  0xff   :  { %v62_v14 = vadd.f32 %v61_v13, %v39_v12 }
 0x101   :  { %v64_v15 = vmax.f32 %v62_v14, 0.0 }
 0x103   :  { %122 = vmatpush.msk.msra.mxu1 %vm70_vm1, %v64_v15 }
 0x104   :  { %123 = vmatmul.msk.f32.vlgmr.msra.gmra.mxu1 %vm66_vm2, %v65_v16 }
 0x181   :  { %v91_v19 = vpop.f32.mrf.mxu1 }
 0x182   :  { %v95_v20 = vmul.f32 %v94_v17, %v91_v19  ;;  %v101_v21 = vmul.f32 %v100_v18, %v91_v19 }
 0x184   :  { %v102_v22 = vsel %vm96_vm3, %v101_v21, 0.0  ;;  %v97_v23 = vsel %vm96_vm3, %v95_v20, 0.0 }
 0x185   :  { %103 = vadd.xlane.f32.xlu1 %v102_v22  ;;  %98 = vadd.xlane.f32.xlu0 %v97_v23 }
 0x1f8   :  { %v99_v24 = vpop.xlane.xlu0 %98  ;;  %v104_v29 = vpop.xlane.xlu1 %103 }
 0x1f9   :  { %v105_v25 = vmul.f32 %v99_v24, %v26_v0  ;;  %v106_v26 = vmul.f32 %v99_v24, %v27_v1  ;;  %v107_v27 = vmul.f32 %v99_v24, %v28_v2  ;;  %v108_v28 = vmul.f32 %v99_v24, %v29_v4 }
 0x1fb   :  { %v109_v30 = vadd.f32 %v105_v25, %v104_v29  ;;  %v110_v31 = vadd.f32 %v106_v26, %v104_v29  ;;  %v111_v32 = vadd.f32 %v107_v27, %v104_v29  ;;  %v112_v33 = vadd.f32 %v108_v28, %v104_v29 }
 0x1fd   :  { %113 = vst [vmem:[%s213_s7] sm:$0xff] %v109_v30 }
 0x1fe   :  { %114 = vst [vmem:[%s213_s7 + $0x8] sm:$0xff] %v110_v31 }
 0x1ff   :  { %115 = vst [vmem:[%s213_s7 + $0x10] sm:$0xff] %v111_v32 }
 0x200   :  { %116 = vst [vmem:[%s213_s7 + $0x18] sm:$0xff] %v112_v33 }

</bundles_post_ra>
